<compile_context>
chip_gen: v7x
topology: tpu7x:2x2x1
jax: 0.10.0
libtpu: 0.0.40
codegen_flags: <defaults>
</compile_context>

<pallas_src>
import functools

import jax
import jax.numpy as jnp
from jax.experimental import pallas as pl
from jax.experimental.pallas import tpu as pltpu

HIDDEN = 500          # matches torch.nn.Linear(in_features, 500)
HIDDEN_PAD = 512      # zero-padded to a multiple of 128 for lane-dense MXU tiles
LANE = 128
SUBLANE = 8
MAX_TILE_N = 512      # row tile upper bound (sweepable); shrunk to fit VMEM budget
# Keep W1 fully VMEM-resident (single-buffered bf16) while under this size;
# beyond that, stream it with a K-reduction grid axis.
W1_RESIDENT_BYTES = 24 * 1024 * 1024
K_TILE = 8192         # K block (multiple of 128) used when streaming W1


def _round_up(x: int, m: int) -> int:
    return (x + m - 1) // m * m


def _vmem_capacity_bytes() -> int:
    try:
        return int(pltpu.get_tpu_info().vmem_capacity_bytes)
    except Exception:
        return 64 * 1024 * 1024   # conservative fallback: v7x per-TC VMEM


def _k_plan(in_features: int):
    """Returns (tile_k, num_k, k_pad): full-K resident vs. K-streamed W1."""
    if in_features * HIDDEN_PAD * 2 <= W1_RESIDENT_BYTES:
        return in_features, 1, in_features
    k_pad = _round_up(in_features, K_TILE)
    return K_TILE, k_pad // K_TILE, k_pad


def _footprint_bytes(tile_n, tile_k, num_k, out_pad):
    """Approximate resident-VMEM footprint of the pipeline for given tiling."""
    w1 = tile_k * HIDDEN_PAD * 2 * (1 if num_k == 1 else 2)   # bf16, 1 or 2 bufs
    w2 = HIDDEN_PAD * out_pad * 2                             # bf16, single buffer
    bias = (HIDDEN_PAD + out_pad) * 4
    x_t = tile_n * tile_k * 4 * 2                             # f32 x, double-buffered
    o_t = tile_n * out_pad * 4 * 2                            # f32 out, double-buffered
    acc = tile_n * HIDDEN_PAD * 4 * (0 if num_k == 1 else 1)  # f32 accumulator scratch
    temps = tile_n * HIDDEN_PAD * 4 + tile_n * out_pad * 4    # f32 h / y temporaries
    return w1 + w2 + bias + x_t + o_t + acc + temps


def _const_spec(shape):
    """BlockSpec for an operand whose block is identical at every grid step
    (single-buffered: double-buffering a constant block is pure VMEM waste)."""
    idx = lambda *_: (0,) * len(shape)
    try:
        return pl.BlockSpec(shape, idx, pipeline_mode=pl.Buffered(1))
    except (AttributeError, TypeError):   # older Pallas without pipeline_mode
        return pl.BlockSpec(shape, idx)


# ----------------------------- kernels --------------------------------------
def _mlp_kernel_fused(x_ref, w1_ref, b1_ref, w2_ref, b2_ref, o_ref):
    # x arrives f32; cast to bf16 on the VPU (hidden under the MXU).
    x = x_ref[...].astype(jnp.bfloat16)
    h = jnp.dot(x, w1_ref[...], preferred_element_type=jnp.float32)
    h = jnp.maximum(h + b1_ref[...], 0.0)                    # f32 bias + ReLU
    y = jnp.dot(h.astype(jnp.bfloat16), w2_ref[...],
                preferred_element_type=jnp.float32)
    o_ref[...] = (y + b2_ref[...]).astype(o_ref.dtype)       # lane-dense store


def _mlp_kernel_ktiled(x_ref, w1_ref, b1_ref, w2_ref, b2_ref, o_ref, acc_ref):
    k = pl.program_id(1)

    @pl.when(k == 0)
    def _():
        acc_ref[...] = jnp.zeros_like(acc_ref)

    x = x_ref[...].astype(jnp.bfloat16)
    acc_ref[...] += jnp.dot(x, w1_ref[...], preferred_element_type=jnp.float32)

    @pl.when(k == pl.num_programs(1) - 1)
    def _():
        h = jnp.maximum(acc_ref[...] + b1_ref[...], 0.0)
        y = jnp.dot(h.astype(jnp.bfloat16), w2_ref[...],
                    preferred_element_type=jnp.float32)
        o_ref[...] = (y + b2_ref[...]).astype(o_ref.dtype)


# ----------------------------- host wrappers --------------------------------
def prepare_params(w1, b1, w2, b2):
    """One-time padding / bf16 cast of the weights. Call once; reuse per step."""
    in_features = w1.shape[0]
    out_features = w2.shape[1]
    _, _, k_pad = _k_plan(in_features)
    out_pad = _round_up(out_features, LANE)
    w1p = jnp.pad(w1, ((0, k_pad - in_features),
                       (0, HIDDEN_PAD - HIDDEN))).astype(jnp.bfloat16)
    b1p = jnp.pad(b1.reshape(1, -1), ((0, 0), (0, HIDDEN_PAD - HIDDEN)))
    w2p = jnp.pad(w2, ((0, HIDDEN_PAD - HIDDEN),
                       (0, out_pad - out_features))).astype(jnp.bfloat16)
    b2p = jnp.pad(b2.reshape(1, -1), ((0, 0), (0, out_pad - out_features)))
    return w1p, b1p, w2p, b2p


@functools.partial(jax.jit, static_argnames=("out_features",))
def my_neural_net(x, w1p, b1p, w2p, b2p, *, out_features):
    """Forward pass of MyNeuralNet: ReLU(x @ W1 + b1) @ W2 + b2.

    x:   [N, in_features]             float32
    w1p: [k_pad, 512]                 bfloat16  (from prepare_params)
    b1p: [1, 512]                     float32
    w2p: [512, out_pad]               bfloat16
    b2p: [1, out_pad]                 float32
    returns [N, out_features]         float32
    """
    n, in_features = x.shape
    out_pad = w2p.shape[1]
    tile_k, num_k, k_pad = _k_plan(in_features)
    assert w1p.shape == (k_pad, HIDDEN_PAD), (w1p.shape, (k_pad, HIDDEN_PAD))

    # ---- batch tiling: fit VMEM budget, then minimize last-tile waste ------
    budget = (_vmem_capacity_bytes() * 3) // 4          # ~48 MiB v7x, ~96 MiB v5e/v6e
    n_al = _round_up(max(n, 1), SUBLANE)
    tile_n = _round_up(min(MAX_TILE_N, n_al), SUBLANE)
    while tile_n > SUBLANE and _footprint_bytes(tile_n, tile_k, num_k, out_pad) > budget:
        tile_n = max(SUBLANE, _round_up(tile_n // 2, SUBLANE))
    num_tiles = pl.cdiv(n_al, tile_n)
    tile_n = _round_up(pl.cdiv(n_al, num_tiles), SUBLANE)   # even out tiles
    n_pad = num_tiles * tile_n

    # Pad x only when needed; no wrapper-side dtype cast (kernel casts to bf16).
    if (n_pad, k_pad) != (n, in_features):
        xp = jnp.pad(x, ((0, n_pad - n), (0, k_pad - in_features)))
    else:
        xp = x

    footprint = _footprint_bytes(tile_n, tile_k, num_k, out_pad)
    vmem_limit = min(budget, max(16 * 1024 * 1024,
                                 _round_up(footprint * 5 // 4, 1 << 20)))

    flops = 2 * n_pad * k_pad * HIDDEN_PAD + 2 * n_pad * HIDDEN_PAD * out_pad
    bytes_accessed = (n_pad * k_pad * 4 + k_pad * HIDDEN_PAD * 2
                      + HIDDEN_PAD * out_pad * 2 + (HIDDEN_PAD + out_pad) * 4
                      + n_pad * out_pad * 4)
    cost = pl.CostEstimate(flops=flops, transcendentals=0,
                           bytes_accessed=bytes_accessed)

    # TODO(synk): for very large out_features also tile the output/W2 columns.
    if num_k == 1:
        out = pl.pallas_call(
            _mlp_kernel_fused,
            out_shape=jax.ShapeDtypeStruct((n_pad, out_pad), jnp.float32),
            grid=(num_tiles,),
            in_specs=[
                # x: tiled along N, double-buffered by the Pallas pipeline.
                pl.BlockSpec((tile_n, k_pad), lambda i: (i, 0)),
                # Weights/biases: constant block -> single-buffered, VMEM-resident.
                _const_spec((k_pad, HIDDEN_PAD)),
                _const_spec((1, HIDDEN_PAD)),
                _const_spec((HIDDEN_PAD, out_pad)),
                _const_spec((1, out_pad)),
            ],
            out_specs=pl.BlockSpec((tile_n, out_pad), lambda i: (i, 0)),
            compiler_params=pltpu.CompilerParams(
                dimension_semantics=("parallel",),
                vmem_limit_bytes=int(vmem_limit)),
            cost_estimate=cost,
        )(xp, w1p, b1p, w2p, b2p)
    else:
        out = pl.pallas_call(
            _mlp_kernel_ktiled,
            out_shape=jax.ShapeDtypeStruct((n_pad, out_pad), jnp.float32),
            grid=(num_tiles, num_k),                       # K last, "arbitrary"
            in_specs=[
                pl.BlockSpec((tile_n, tile_k), lambda i, k: (i, k)),
                pl.BlockSpec((tile_k, HIDDEN_PAD), lambda i, k: (k, 0)),
                _const_spec((1, HIDDEN_PAD)),
                _const_spec((HIDDEN_PAD, out_pad)),
                _const_spec((1, out_pad)),
            ],
            out_specs=pl.BlockSpec((tile_n, out_pad), lambda i, k: (i, 0)),
            scratch_shapes=[pltpu.VMEM((tile_n, HIDDEN_PAD), jnp.float32)],
            compiler_params=pltpu.CompilerParams(
                dimension_semantics=("parallel", "arbitrary"),
                vmem_limit_bytes=int(vmem_limit)),
            cost_estimate=cost,
        )(xp, w1p, b1p, w2p, b2p)

    return out[:n, :out_features]


# ----------------------------- test harness ---------------------------------
def init_params(key, in_features, out_features):
    """Deterministic PyTorch-style init: U(-1/sqrt(fan_in), 1/sqrt(fan_in))."""
    k1, k2, k3, k4 = jax.random.split(key, 4)
    bound1 = 1.0 / jnp.sqrt(in_features)
    bound2 = 1.0 / jnp.sqrt(HIDDEN)
    w1 = jax.random.uniform(k1, (in_features, HIDDEN), jnp.float32, -bound1, bound1)
    b1 = jax.random.uniform(k2, (HIDDEN,), jnp.float32, -bound1, bound1)
    w2 = jax.random.uniform(k3, (HIDDEN, out_features), jnp.float32, -bound2, bound2)
    b2 = jax.random.uniform(k4, (out_features,), jnp.float32, -bound2, bound2)
    return w1, b1, w2, b2


def reference(x, w1, b1, w2, b2):
    h = jnp.maximum(x @ w1 + b1, 0.0)
    return h @ w2 + b2


if __name__ == "__main__":
    in_features, out_features, batch = 32, 16, 8
    key = jax.random.PRNGKey(0)
    kx, kp = jax.random.split(key)
    x = jax.random.normal(kx, (batch, in_features), jnp.float32)
    w1, b1, w2, b2 = init_params(kp, in_features, out_features)

    # One-time weight preparation (pad + bf16 cast), reused on every forward.
    params = jax.block_until_ready(prepare_params(w1, b1, w2, b2))

    out = jax.block_until_ready(
        my_neural_net(x, *params, out_features=out_features))

    ref = reference(x, w1, b1, w2, b2)
    assert out.shape == (batch, out_features), out.shape
    # bf16 MXU operands with f32 accumulation -> compare at a looser tolerance.
    assert jnp.allclose(out, ref, atol=1e-2, rtol=1e-2), \
        float(jnp.max(jnp.abs(out - ref)))
    print("KERNEL_OK")
</pallas_src>

<mosaic_0001>
module attributes {stable_mosaic.version = 11 : i64} {
  func.func @_mlp_kernel_fused(%arg0: i32, %arg1: memref<8x32xf32, #tpu.memory_space<vmem>>, %arg2: memref<32x512xbf16, #tpu.memory_space<vmem>>, %arg3: memref<1x512xf32, #tpu.memory_space<vmem>>, %arg4: memref<512x128xbf16, #tpu.memory_space<vmem>>, %arg5: memref<1x128xf32, #tpu.memory_space<vmem>>, %arg6: memref<8x128xf32, #tpu.memory_space<vmem>>) attributes {dimension_semantics = [#tpu.dimension_semantics<parallel>], iteration_bounds = array<i64: 1>, scalar_prefetch = 0 : i64, scratch_operands = 0 : i64, tpu.core_type = #tpu.core_type<tc>, window_params = [{transform_indices = @transform_0, window_bounds = array<i64: 8, 32>}, {pipeline_mode = #tpu.pipeline_mode<synchronous>, transform_indices = @transform_1, window_bounds = array<i64: 32, 512>}, {pipeline_mode = #tpu.pipeline_mode<synchronous>, transform_indices = @transform_2, window_bounds = array<i64: 1, 512>}, {pipeline_mode = #tpu.pipeline_mode<synchronous>, transform_indices = @transform_3, window_bounds = array<i64: 512, 128>}, {pipeline_mode = #tpu.pipeline_mode<synchronous>, transform_indices = @transform_4, window_bounds = array<i64: 1, 128>}, {transform_indices = @transform_5, window_bounds = array<i64: 8, 128>}]} {
    %c0 = arith.constant 0 : index
    %c0_0 = arith.constant 0 : index
    %0 = vector.load %arg1[%c0, %c0_0] : memref<8x32xf32, #tpu.memory_space<vmem>>, vector<8x32xf32>
    %1 = arith.truncf %0 : vector<8x32xf32> to vector<8x32xbf16>
    %c0_1 = arith.constant 0 : index
    %c0_2 = arith.constant 0 : index
    %2 = vector.load %arg2[%c0_1, %c0_2] : memref<32x512xbf16, #tpu.memory_space<vmem>>, vector<32x512xbf16>
    %cst = arith.constant dense<0.000000e+00> : vector<8x512xf32>
    %3 = tpu.matmul %1, %2, %cst {dimension_numbers = #tpu.dot_dimension_numbers<[1], [0], [0], [1], [0, 0, 1, 1], [], []>} : vector<8x32xbf16>, vector<32x512xbf16>, vector<8x512xf32> -> vector<8x512xf32>
    %c0_3 = arith.constant 0 : index
    %c0_4 = arith.constant 0 : index
    %4 = vector.load %arg3[%c0_3, %c0_4] : memref<1x512xf32, #tpu.memory_space<vmem>>, vector<1x512xf32>
    %5 = vector.broadcast %4 : vector<1x512xf32> to vector<8x512xf32>
    %6 = arith.addf %3, %5 : vector<8x512xf32>
    %cst_5 = arith.constant 0.000000e+00 : f32
    %7 = vector.broadcast %cst_5 : f32 to vector<8x512xf32>
    %8 = arith.maximumf %6, %7 : vector<8x512xf32>
    %9 = arith.truncf %8 : vector<8x512xf32> to vector<8x512xbf16>
    %c0_6 = arith.constant 0 : index
    %c0_7 = arith.constant 0 : index
    %10 = vector.load %arg4[%c0_6, %c0_7] : memref<512x128xbf16, #tpu.memory_space<vmem>>, vector<512x128xbf16>
    %cst_8 = arith.constant dense<0.000000e+00> : vector<8x128xf32>
    %11 = tpu.matmul %9, %10, %cst_8 {dimension_numbers = #tpu.dot_dimension_numbers<[1], [0], [0], [1], [0, 0, 1, 1], [], []>} : vector<8x512xbf16>, vector<512x128xbf16>, vector<8x128xf32> -> vector<8x128xf32>
    %c0_9 = arith.constant 0 : index
    %c0_10 = arith.constant 0 : index
    %12 = vector.load %arg5[%c0_9, %c0_10] : memref<1x128xf32, #tpu.memory_space<vmem>>, vector<1x128xf32>
    %13 = vector.broadcast %12 : vector<1x128xf32> to vector<8x128xf32>
    %14 = arith.addf %11, %13 : vector<8x128xf32>
    %c0_11 = arith.constant 0 : index
    %c0_12 = arith.constant 0 : index
    %15 = vector.load %arg6[%c0_11, %c0_12] : memref<8x128xf32, #tpu.memory_space<vmem>>, vector<8x128xf32>
    tpu.vector_store %arg6[%c0_11, %c0_12], %14 {strides = array<i32>} : memref<8x128xf32, #tpu.memory_space<vmem>>, vector<8x128xf32>,
    return
  }
  func.func @transform_0(%arg0: i32) -> (i32, i32) {
    %c0_i32 = arith.constant 0 : i32
    %c0_i32_0 = arith.constant 0 : i32
    return %arg0, %c0_i32 : i32, i32
  }
  func.func @transform_1(%arg0: i32) -> (i32, i32) {
    %c0_i32 = arith.constant 0 : i32
    %c0_i32_0 = arith.constant 0 : i32
    %c0_i32_1 = arith.constant 0 : i32
    return %c0_i32, %c0_i32_0 : i32, i32
  }
  func.func @transform_2(%arg0: i32) -> (i32, i32) {
    %c0_i32 = arith.constant 0 : i32
    %c0_i32_0 = arith.constant 0 : i32
    %c0_i32_1 = arith.constant 0 : i32
    return %c0_i32, %c0_i32_0 : i32, i32
  }
  func.func @transform_3(%arg0: i32) -> (i32, i32) {
    %c0_i32 = arith.constant 0 : i32
    %c0_i32_0 = arith.constant 0 : i32
    %c0_i32_1 = arith.constant 0 : i32
    return %c0_i32, %c0_i32_0 : i32, i32
  }
  func.func @transform_4(%arg0: i32) -> (i32, i32) {
    %c0_i32 = arith.constant 0 : i32
    %c0_i32_0 = arith.constant 0 : i32
    %c0_i32_1 = arith.constant 0 : i32
    return %c0_i32, %c0_i32_0 : i32, i32
  }
  func.func @transform_5(%arg0: i32) -> (i32, i32) {
    %c0_i32 = arith.constant 0 : i32
    %c0_i32_0 = arith.constant 0 : i32
    return %arg0, %c0_i32 : i32, i32
  }
}

</mosaic_0001>

<bundles_post_ra>
// kernel: my_neural_net.1
= control target key start
LH: loop header
LB: loop body
LE: loop exit
PB: predicated region body
PF: predicated region fallthrough
CT: control target
= control target key end

     0   :  { %10 = vsyncpa [#allocation3], 0  ;;  %s914_s0 = inlined_call_operand.hbm [shape: f32[8,32], index: 0, kind: input, shape index: {}]   ;;  %s915_s1 = inlined_call_operand.hbm [shape: bf16[32,512], index: 1, kind: input, shape index: {}]   ;;  %s916_s2 = inlined_call_operand.vmem [shape: f32[1,512], index: 2, kind: input, shape index: {}]   ;;  %s917_s3 = inlined_call_operand.hbm [shape: bf16[512,128], index: 3, kind: input, shape index: {}]   ;;  %s918_s4 = inlined_call_operand.vmem [shape: f32[1,128], index: 4, kind: input, shape index: {}]   ;;  %s919_s5 = inlined_call_operand.hbm [shape: f32[8,128], index: 5, kind: output, shape index: {}]  }
   0x1   :  { %11 = vsyncpa [#allocation6], 0 }
   0x2   :  { %12 = vsyncpa [#allocation4], 0  ;;  %s821_s18 = smov [#allocation5]   ;;  %s727_s22 = scalar_lea.hbm %s915_s1, 1024 }
   0x3   :  { %s28_s19 = sshll.u32 %s821_s18, 4  ;;  %p728_p0 = scmp.ne.s32.totalorder %s915_s1, %s727_s22  ;;  %s29_s19 = int_to_ptr.vmem [resolvable:$true] %s28_s19 }
   0x4   :  { %p731_p1 = scmp.lt.u32.totalorder %s727_s22, %s915_s1 }
   0x6   :  { %p733_p2 = pnand %p731_p1, %p728_p0 }
   0x8   :  { %736 = shalt.err (!%p733_p2)
}
   0x9   :  { %s737_s27 = scalar_lea.vmem %s29_s19, 1024  ;;  %p742_p4 = scmp.lt.s32.totalorder %s29_s19, %s29_s19 }
   0xa   :  { %p738_p3 = scmp.ne.s32.totalorder %s29_s19, %s737_s27  ;;  %p743_p5 = scmp.lt.s32.totalorder %s737_s27, %s737_s27 }
   0xc   :  { %p744_p6 = por %p743_p5, %p742_p4 }
   0xe   :  { %p745_p7 = pnand %p744_p6, %p738_p3 }
  0x10   :  { %748 = shalt.err (!%p745_p7)
}
  0x11   :  { %s822_s28 = smov 256   ;;  %s823_s29 = smov 16  }
  0x12   :  { %34 = dma.hbm_to_vmem [thread:$0]  %s915_s1, 1024, %s29_s19, [#allocation6], %s822_s28, %s822_s28, %s823_s29  }
  0x13   :  { %s824_s7 = smov [#allocation2]   ;;  %s825_s9 = smov [#allocation7]  }
  0x14   :  { %s19_s8 = sshll.u32 %s824_s7, 4  ;;  %s42_s10 = sshll.u32 %s825_s9, 4  ;;  %s20_s8 = int_to_ptr.vmem [resolvable:$true] %s19_s8  ;;  %s43_s10 = int_to_ptr.vmem [resolvable:$true] %s42_s10 }
  0x15   :  { %s749_s13 = scalar_lea.hbm %s914_s0, 128 }
  0x16   :  { %p750_p8 = scmp.ne.s32.totalorder %s914_s0, %s749_s13  ;;  %p753_p9 = scmp.lt.u32.totalorder %s749_s13, %s914_s0 }
  0x18   :  { %p755_p10 = pnand %p753_p9, %p750_p8 }
  0x1a   :  { %758 = shalt.err (!%p755_p10)
}
  0x1b   :  { %s759_s1 = scalar_lea.vmem %s20_s8, 128  ;;  %p764_p12 = scmp.lt.s32.totalorder %s20_s8, %s20_s8 }
  0x1c   :  { %p760_p11 = scmp.ne.s32.totalorder %s20_s8, %s759_s1  ;;  %p765_p13 = scmp.lt.s32.totalorder %s759_s1, %s759_s1 }
  0x1e   :  { %p766_p0 = por %p765_p13, %p764_p12 }
  0x20   :  { %p767_p1 = pnand %p766_p0, %p760_p11 }
  0x22   :  { %770 = shalt.err (!%p767_p1)
}
  0x23   :  { %22 = dma.hbm_to_vmem [thread:$0]  %s914_s0, 128, %s20_s8, [#allocation3]  }
  0x24   :  { %s771_s22 = scalar_lea.hbm %s917_s3, 4096 }
  0x25   :  { %p772_p2 = scmp.ne.s32.totalorder %s917_s3, %s771_s22  ;;  %p775_p3 = scmp.lt.u32.totalorder %s771_s22, %s917_s3 }
  0x27   :  { %p777_p4 = pnand %p775_p3, %p772_p2 }
  0x29   :  { %780 = shalt.err (!%p777_p4)
}
  0x2a   :  { %s781_s27 = scalar_lea.vmem %s43_s10, 4096  ;;  %p786_p6 = scmp.lt.s32.totalorder %s43_s10, %s43_s10 }
  0x2b   :  { %p782_p5 = scmp.ne.s32.totalorder %s43_s10, %s781_s27  ;;  %p787_p7 = scmp.lt.s32.totalorder %s781_s27, %s781_s27 }
  0x2d   :  { %p788_p8 = por %p787_p7, %p786_p6 }
  0x2f   :  { %p789_p9 = pnand %p788_p8, %p782_p5 }
  0x31   :  { %792 = shalt.err (!%p789_p9)
}
  0x32   :  { %s826_s0 = smov 64   ;;  %s827_s28 = smov 4  }
  0x33   :  { %48 = dma.hbm_to_vmem [thread:$0]  %s917_s3, 4096, %s43_s10, [#allocation6], %s826_s0, %s826_s0, %s827_s28  }
  0x34   :  { %815 = dma.done.wait [#allocation3], 128  }
  0x35   :  { %816 = vsyncadd [#allocation3], 4294967168 }
  0x36   :  { %817 = dma.done.wait [#allocation6], 5120  }
  0x37   :  { %818 = vsyncadd [#allocation6], 4294962176  ;;  %v828_v0 = vmov 0   ;;  %v683_v1 = vld [vmem:[#allocation5 + $0x4] ss:$16 sps:$4 sm:$0xff]   ;;  %v61_v9 = vld [vmem:[#allocation2] sm:$0xff]  ;;  %v73_v43 = vlaneseq }
  0x38   :  { %169 = vmatprep.mubr.bf16.mxu0 %v828_v0  ;;  %210 = vmatprep.mubr.bf16.mxu1 %v828_v0  ;;  %v685_v2 = vld [vmem:[#allocation5 + $0xc] ss:$16 sps:$4 sm:$0xff]   ;;  %v687_v3 = vld [vmem:[#allocation5] ss:$16 sps:$4 sm:$0xff]   ;;  %v688_v4 = vld [vmem:[#allocation5 + $0x8] ss:$16 sps:$4 sm:$0xff]   ;;  %v62_v11 = vpack.c.bf16 %v61_v9, %v61_v9 }
  0x39   :  { %137 = vmatprep.subr.bf16.mxu0 %v683_v1  ;;  %178 = vmatprep.subr.bf16.mxu1 %v685_v2  ;;  %v689_v5 = vld [vmem:[#allocation5 + $0x24] ss:$16 sps:$4 sm:$0xff]   ;;  %v691_v6 = vld [vmem:[#allocation5 + $0x2c] ss:$16 sps:$4 sm:$0xff]   ;;  %v693_v7 = vld [vmem:[#allocation5 + $0x20] ss:$16 sps:$4 sm:$0xff]  }
  0x3a   :  { %138 = vmatpush1.bf16.msra.mxu0 %v687_v3  ;;  %179 = vmatpush1.bf16.msra.mxu1 %v688_v4  ;;  %v694_v8 = vld [vmem:[#allocation5 + $0x28] ss:$16 sps:$4 sm:$0xff]   ;;  %v695_v10 = vld [vmem:[#allocation7 + $0x40] sm:$0xff]   ;;  %vm133_vm0 = vcmask 261120   ;;  %v703_v19 = vld [vmem:[#allocation7 + $0x50] sm:$0xff]   ;;  %v74_v44 = vshrl.u32 %v73_v43, 7 }
  0x3b   :  { %139 = vmatprep.subr.bf16.mxu0 %v689_v5  ;;  %180 = vmatprep.subr.bf16.mxu1 %v691_v6  ;;  %v696_v12 = vld [vmem:[#allocation7 + $0xc0] sm:$0xff]   ;;  %v699_v15 = vld [vmem:[#allocation7 + $0x48] sm:$0xff]   ;;  %v704_v20 = vld [vmem:[#allocation7 + $0xd0] sm:$0xff]   ;;  %s829_s8 = smov [#allocation8]  }
  0x3c   :  { %v697_v13 = vld [vmem:[#allocation7] sm:$0xff]   ;;  %v700_v16 = vld [vmem:[#allocation7 + $0xc8] sm:$0xff]   ;;  %v705_v21 = vld [vmem:[#allocation7 + $0x10] sm:$0xff]   ;;  %v75_v45 = vsub.s32 0, %v74_v44  ;;  %v83_v46 = vsub.s32 2, %v74_v44  ;;  %v79_v48 = vsub.s32 1, %v74_v44 }
  0x3d   :  { %v698_v14 = vld [vmem:[#allocation7 + $0x80] sm:$0xff]   ;;  %v701_v17 = vld [vmem:[#allocation7 + $0x8] sm:$0xff]   ;;  %v706_v22 = vld [vmem:[#allocation7 + $0x90] sm:$0xff]   ;;  %v87_v49 = vsub.s32 3, %v74_v44  ;;  %s577_s9 = sshll.u32 %s829_s8, 4  ;;  %s578_s9 = int_to_ptr.vmem [resolvable:$true] %s577_s9 }
  0x3e   :  { %140 = vmatpush1.bf16.msra.mxu0 %v693_v7  ;;  %181 = vmatpush1.bf16.msra.mxu1 %v694_v8  ;;  %v702_v18 = vld [vmem:[#allocation7 + $0x88] sm:$0xff]   ;;  %v707_v23 = vld [vmem:[#allocation7 + $0x58] sm:$0xff]   ;;  %v711_v27 = vld [vmem:[#allocation7 + $0x60] sm:$0xff]   ;;  %s793_s10 = scalar_lea.vmem %s578_s9, 128  ;;  %p798_p11 = scmp.lt.s32.totalorder %s578_s9, %s578_s9 }
  0x3f   :  { %630 = vmatprep.subr.bf16.mxu0 %v695_v10  ;;  %652 = vmatprep.subr.bf16.mxu1 %v696_v12  ;;  %v708_v24 = vld [vmem:[#allocation7 + $0xd8] sm:$0xff]   ;;  %v712_v28 = vld [vmem:[#allocation7 + $0xe0] sm:$0xff]   ;;  %v715_v31 = vld [vmem:[#allocation7 + $0x68] sm:$0xff]   ;;  %p794_p10 = scmp.ne.s32.totalorder %s578_s9, %s793_s10  ;;  %p799_p12 = scmp.lt.s32.totalorder %s793_s10, %s793_s10 }
  0x40   :  { %v709_v25 = vld [vmem:[#allocation7 + $0x18] sm:$0xff]   ;;  %v713_v29 = vld [vmem:[#allocation7 + $0x20] sm:$0xff]   ;;  %v716_v32 = vld [vmem:[#allocation7 + $0xe8] sm:$0xff]  }
  0x41   :  { %595 = vmatmul.mubr.msk.bf16.vlgmr.msra.gmra.mrb[0].mxu0 %vm133_vm0, %v62_v11  ;;  %596 = vmatmul.mubr.msk.bf16.vlgmr.msra.gmra.mrb[0].mxu1 %vm133_vm0, %v62_v11  ;;  %v710_v26 = vld [vmem:[#allocation7 + $0x98] sm:$0xff]   ;;  %v714_v30 = vld [vmem:[#allocation7 + $0xa0] sm:$0xff]   ;;  %v717_v33 = vld [vmem:[#allocation7 + $0x28] sm:$0xff]   ;;  %p800_p13 = por %p799_p12, %p798_p11 }
  0x42   :  { %631 = vmatpush3.bf16.msra.mxu0 %v697_v13  ;;  %653 = vmatpush3.bf16.msra.mxu1 %v698_v14  ;;  %v718_v34 = vld [vmem:[#allocation7 + $0xa8] sm:$0xff]   ;;  %v719_v35 = vld [vmem:[#allocation7 + $0x70] sm:$0xff]   ;;  %v723_v39 = vld [vmem:[#allocation7 + $0x78] sm:$0xff]  }
  0x43   :  { %632 = vmatprep.subr.bf16.mxu0 %v699_v15  ;;  %654 = vmatprep.subr.bf16.mxu1 %v700_v16  ;;  %v720_v36 = vld [vmem:[#allocation7 + $0xf0] sm:$0xff]   ;;  %v724_v40 = vld [vmem:[#allocation7 + $0xf8] sm:$0xff]   ;;  %p801_p0 = pnand %p800_p13, %p794_p10 }
  0x44   :  { %v721_v37 = vld [vmem:[#allocation7 + $0x30] sm:$0xff]   ;;  %v725_v41 = vld [vmem:[#allocation7 + $0x38] sm:$0xff]  }
  0x45   :  { %v722_v38 = vld [vmem:[#allocation7 + $0xb0] sm:$0xff]   ;;  %v726_v42 = vld [vmem:[#allocation7 + $0xb8] sm:$0xff]  }
  0x46   :  { %633 = vmatpush3.bf16.msra.mxu0 %v701_v17  ;;  %655 = vmatpush3.bf16.msra.mxu1 %v702_v18  ;;  %v71_v47 = vld [vmem:[%s916_s2] sm:$0xf] }
  0x47   :  { %634 = vmatprep.subr.bf16.mxu0 %v703_v19  ;;  %656 = vmatprep.subr.bf16.mxu1 %v704_v20  ;;  %v76_v50 = vrot.slane %v71_v47, %v75_v45  ;;  %v84_v51 = vrot.slane %v71_v47, %v83_v46  ;;  %v80_v52 = vrot.slane %v71_v47, %v79_v48  ;;  %v597_v12 = vld [vmem:[%s918_s4] ss:$0 sm:$0xff] }
  0x48   :  { %v88_v53 = vrot.slane %v71_v47, %v87_v49 }
  0x4a   :  { %635 = vmatpush3.bf16.msra.mxu0 %v705_v21  ;;  %657 = vmatpush3.bf16.msra.mxu1 %v706_v22 }
  0x4b   :  { %636 = vmatprep.subr.bf16.mxu0 %v707_v23  ;;  %658 = vmatprep.subr.bf16.mxu1 %v708_v24 }
  0x4e   :  { %637 = vmatpush3.bf16.msra.mxu0 %v709_v25  ;;  %659 = vmatpush3.bf16.msra.mxu1 %v710_v26 }
  0x4f   :  { %638 = vmatprep.subr.bf16.mxu0 %v711_v27  ;;  %660 = vmatprep.subr.bf16.mxu1 %v712_v28 }
  0x52   :  { %639 = vmatpush3.bf16.msra.mxu0 %v713_v29  ;;  %661 = vmatpush3.bf16.msra.mxu1 %v714_v30 }
  0x53   :  { %640 = vmatprep.subr.bf16.mxu0 %v715_v31  ;;  %662 = vmatprep.subr.bf16.mxu1 %v716_v32 }
  0x56   :  { %641 = vmatpush3.bf16.msra.mxu0 %v717_v33  ;;  %663 = vmatpush3.bf16.msra.mxu1 %v718_v34 }
  0x57   :  { %642 = vmatprep.subr.bf16.mxu0 %v719_v35  ;;  %664 = vmatprep.subr.bf16.mxu1 %v720_v36 }
  0x5a   :  { %643 = vmatpush3.bf16.msra.mxu0 %v721_v37  ;;  %665 = vmatpush3.bf16.msra.mxu1 %v722_v38 }
  0x5b   :  { %644 = vmatprep.subr.bf16.mxu0 %v723_v39  ;;  %666 = vmatprep.subr.bf16.mxu1 %v724_v40 }
  0x5e   :  { %645 = vmatpush3.bf16.msra.mxu0 %v725_v41  ;;  %667 = vmatpush3.bf16.msra.mxu1 %v726_v42 }
 0x114   :  { %v171_v54 = vpop.f32.mrb[0].mxu0  ;;  %v212_v55 = vpop.f32.mrb[0].mxu1 }
 0x115   :  { %v172_v56 = vadd.f32 %v171_v54, %v76_v50  ;;  %v213_v57 = vadd.f32 %v212_v55, %v84_v51  ;;  %v173_v58 = vpop.f32.mrb[1].mxu0  ;;  %v214_v59 = vpop.f32.mrb[1].mxu1 }
 0x116   :  { %v174_v60 = vadd.f32 %v173_v58, %v80_v52  ;;  %v215_v61 = vadd.f32 %v214_v59, %v88_v53  ;;  %v175_v62 = vpop.f32.mrb[2].mxu0  ;;  %v216_v63 = vpop.f32.mrb[2].mxu1 }
 0x117   :  { %v219_v0 = vmax.f32 %v172_v56, 0.0  ;;  %v221_v1 = vmax.f32 %v213_v57, 0.0  ;;  %v176_v2 = vpop.f32.mrb[3].mxu0  ;;  %v217_v3 = vpop.f32.mrb[3].mxu1 }
 0x118   :  { %v220_v4 = vmax.f32 %v174_v60, 0.0  ;;  %v222_v5 = vmax.f32 %v215_v61, 0.0 }
 0x119   :  { %v225_v6 = vpack.c.bf16 %v221_v1, %v221_v1  ;;  %v223_v9 = vpack.c.bf16 %v219_v0, %v219_v0 }
 0x11a   :  { %v224_v7 = vpack.c.bf16 %v220_v4, %v220_v4  ;;  %v226_v8 = vpack.c.bf16 %v222_v5, %v222_v5 }
 0x11c   :  { %522 = vmatprep.mubr.bf16.mxu0 %v224_v7  ;;  %562 = vmatprep.mubr.bf16.mxu1 %v226_v8 }
 0x11d   :  { %523 = vmatmul.mubr.bf16.vlgmr.msra.gmra.mrb[4].mxu0 %v223_v9  ;;  %563 = vmatmul.mubr.bf16.vlgmr.msra.gmra.mrb[4].mxu1 %v225_v6 }
 0x1f0   :  { %v646_v10 = vpop.f32.mrb[4].mxu0  ;;  %v668_v11 = vpop.f32.mrb[4].mxu1 }
 0x1f1   :  { %v647_v13 = vpop.f32.mrb[5].mxu0  ;;  %v669_v14 = vpop.f32.mrb[5].mxu1 }
 0x1f2   :  { %v648_v15 = vadd.f32 %v647_v13, %v646_v10  ;;  %v670_v16 = vadd.f32 %v669_v14, %v668_v11  ;;  %v649_v17 = vpop.f32.mrb[6].mxu0  ;;  %v671_v18 = vpop.f32.mrb[6].mxu1 }
 0x1f3   :  { %v650_v19 = vpop.f32.mrb[7].mxu0  ;;  %v672_v20 = vpop.f32.mrb[7].mxu1 }
 0x1f4   :  { %v525_v21 = vadd.f32 %v648_v15, %v597_v12 }
 0x1f6   :  { %v565_v22 = vadd.f32 %v670_v16, %v525_v21 }
 0x1f8   :  { %570 = vst [vmem:[#allocation8] sm:$0xff] %v565_v22 }
 0x1f9   :  { %804 = shalt.err (!%p801_p0)
}
 0x1fa   :  { %s805_s12 = scalar_lea.hbm %s919_s5, 128 }
 0x1fb   :  { %p806_p1 = scmp.ne.s32.totalorder %s919_s5, %s805_s12  ;;  %p809_p2 = scmp.lt.u32.totalorder %s805_s12, %s919_s5 }
 0x1fd   :  { %p811_p3 = pnand %p809_p2, %p806_p1 }
 0x1ff   :  { %814 = shalt.err (!%p811_p3)
}
 0x200   :  { %580 = dma.vmem_to_hbm [thread:$0]  %s578_s9, 128, %s919_s5, [#allocation4]  }
 0x201   :  { %819 = dma.done.wait [#allocation4], 128  }
 0x202   :  { %820 = vsyncadd [#allocation4], 4294967168 }
 0x203   :  { %584 = vsyncpa [#allocation3], 1 }
 0x204   :  { %585 = vsyncpa [#allocation6], 1 }
 0x205   :  { %586 = vsyncpa [#allocation4], 1 }

</bundles_post_ra>
